<compile_context>
chip_gen: v7x
topology: tpu7x:2x2x1
jax: 0.10.0
libtpu: 0.0.40
codegen_flags: <defaults>
</compile_context>

<pallas_src>
import math
import functools

import jax
import jax.numpy as jnp
import numpy as np
from jax.experimental import pallas as pl
from jax.experimental.pallas import tpu as pltpu


_TILE_CANDIDATES = (512, 256, 128, 64, 32, 16, 8)


def _pick_tile(L, row_bytes, fixed_bytes, budget_bytes):
    """Largest candidate tile dividing L whose VMEM estimate fits the budget."""
    divs = [t for t in _TILE_CANDIDATES if L % t == 0]
    if not divs:
        return L  # full extent is always a legal block shape
    for t in divs:
        if fixed_bytes + t * row_bytes <= budget_bytes:
            return t
    return divs[-1]


def _clamp_vmem_limit(estimate_bytes):
    # Leave headroom over the estimate; stay well under v7x's 64 MiB physical VMEM.
    return int(min(max(2 * estimate_bytes, 16 * 2**20), 48 * 2**20))


# ---------------------------------------------------------------------------
# Kernel 1: K/V projection. Runs once per (batch, Lk tile) -- NOT per query
# tile -- and emits K/V already split per head as bf16 (B, H, Lk, hd).
# ---------------------------------------------------------------------------
def _kv_proj_kernel(y_ref, wk_ref, wv_ref, bk_ref, bv_ref, kh_ref, vh_ref,
                    *, num_heads, head_dim):
    y = y_ref[0]                                                    # (TK, D) bf16
    k = jnp.dot(y, wk_ref[...], preferred_element_type=jnp.float32) + bk_ref[...]
    v = jnp.dot(y, wv_ref[...], preferred_element_type=jnp.float32) + bv_ref[...]
    tk = k.shape[0]
    kh_ref[0] = (k.reshape(tk, num_heads, head_dim)
                  .transpose(1, 0, 2).astype(kh_ref.dtype))         # (H, TK, hd)
    vh_ref[0] = (v.reshape(tk, num_heads, head_dim)
                  .transpose(1, 0, 2).astype(vh_ref.dtype))


# ---------------------------------------------------------------------------
# Kernel 2: Pre-LN + Q projection + attention + output projection + residual.
# ---------------------------------------------------------------------------
def _cross_attn_kernel(x_ref, kh_ref, vh_ref, wq_ref, wo_ref,
                       bq_ref, bo_ref, ln_g_ref, ln_b_ref,
                       *out_refs, num_heads, head_dim, ln_eps, need_weights):
    out_ref = out_refs[0]
    x = x_ref[0]                                  # (TQ, D) f32 (residual source)

    # ---- Pre-LN (f32) ----
    mean = jnp.mean(x, axis=-1, keepdims=True)
    xc = x - mean
    var = jnp.mean(xc * xc, axis=-1, keepdims=True)
    xn = xc * jax.lax.rsqrt(var + ln_eps)
    xn = xn * ln_g_ref[...] + ln_b_ref[...]

    # ---- Q projection (1/sqrt(hd) already folded into wq/bq on the host) ----
    q = jnp.dot(xn.astype(jnp.bfloat16), wq_ref[...],
                preferred_element_type=jnp.float32) + bq_ref[...]
    tq = q.shape[0]
    H, hd = num_heads, head_dim
    qh = q.reshape(tq, H, hd).transpose(1, 0, 2).astype(jnp.bfloat16)   # (H, TQ, hd)

    kh = kh_ref[0]                                # (H, Lk, hd) bf16, precomputed
    vh = vh_ref[0]                                # (H, Lk, hd) bf16, precomputed

    # ---- Scores: head-batched matmul, contraction on the last dims ----
    scores = jax.lax.dot_general(
        qh, kh, (((2,), (2,)), ((0,), (0,))),
        preferred_element_type=jnp.float32)       # (H, TQ, Lk) f32

    # TODO(synk): key_padding_mask / attn_mask not supported (module defaults are None).

    # ---- Softmax (f32, max-subtracted; reciprocal on the EUP slot) ----
    m = jnp.max(scores, axis=-1, keepdims=True)
    e = jnp.exp(scores - m)
    denom = jnp.sum(e, axis=-1, keepdims=True)
    p = e * pl.reciprocal(denom, approx=True)     # (H, TQ, Lk) f32

    # ---- Context: head-batched matmul ----
    ctx = jax.lax.dot_general(
        p.astype(jnp.bfloat16), vh, (((2,), (1,)), ((0,), (0,))),
        preferred_element_type=jnp.float32)       # (H, TQ, hd)
    # Merge heads, then project with the full-D contraction (MXU efficiency anchor).
    ctx = ctx.transpose(1, 0, 2).reshape(tq, H * hd)

    attn_out = jnp.dot(ctx.astype(jnp.bfloat16), wo_ref[...],
                       preferred_element_type=jnp.float32) + bo_ref[...]
    out_ref[0] = x + attn_out                     # dropout rate 0.0 -> identity

    if need_weights:
        # PyTorch default average_attn_weights=True -> mean over heads; bf16 writeback.
        out_refs[1][0] = jnp.mean(p, axis=0).astype(out_refs[1].dtype)


def cross_attention_layer(x, y, params, *, num_heads, ln_eps=1e-5,
                          need_weights=True, weights_dtype=jnp.bfloat16):
    B, Lq, D = x.shape
    _, Lk, _ = y.shape
    assert D % num_heads == 0
    H = num_heads
    hd = D // H

    # ---- Host-side parameter prep (static, done once) ----
    scale = 1.0 / math.sqrt(hd)
    wq = (params["wq"] * scale).astype(jnp.bfloat16)     # fold softmax scale into wq/bq
    bq = params["bq"] * scale
    wk = params["wk"].astype(jnp.bfloat16)
    wv = params["wv"].astype(jnp.bfloat16)
    wo = params["wo"].astype(jnp.bfloat16)
    y_b = y.astype(jnp.bfloat16)                          # y only ever consumed in bf16

    # ---------------- K/V projection pallas_call (once per batch) ----------------
    kv_fixed = 2 * 2 * D * D * 2                      # wk, wv bf16, double-buffered
    kv_row = (2 * D * 2                               # y tile bf16, double-buffered
              + 2 * 2 * D * 2                         # kh, vh output tiles bf16, dbl-buf
              + 3 * D * 4)                            # f32 temporaries
    tile_k = _pick_tile(Lk, kv_row, kv_fixed, 16 * 2**20)
    n_kt = Lk // tile_k

    kv_kernel = functools.partial(_kv_proj_kernel, num_heads=H, head_dim=hd)
    kh, vh = pl.pallas_call(
        kv_kernel,
        out_shape=(jax.ShapeDtypeStruct((B, H, Lk, hd), jnp.bfloat16),
                   jax.ShapeDtypeStruct((B, H, Lk, hd), jnp.bfloat16)),
        grid_spec=pltpu.PrefetchScalarGridSpec(
            num_scalar_prefetch=0,
            grid=(B, n_kt),
            in_specs=[
                pl.BlockSpec((1, tile_k, D), lambda b, ki: (b, ki, 0)),   # y tile (bf16)
                pl.BlockSpec((D, D), lambda b, ki: (0, 0)),               # wk
                pl.BlockSpec((D, D), lambda b, ki: (0, 0)),               # wv
                pl.BlockSpec((1, D), lambda b, ki: (0, 0)),               # bk
                pl.BlockSpec((1, D), lambda b, ki: (0, 0)),               # bv
            ],
            out_specs=[
                pl.BlockSpec((1, H, tile_k, hd), lambda b, ki: (b, 0, ki, 0)),
                pl.BlockSpec((1, H, tile_k, hd), lambda b, ki: (b, 0, ki, 0)),
            ],
        ),
        compiler_params=pltpu.CompilerParams(
            dimension_semantics=("parallel", "parallel"),
            vmem_limit_bytes=_clamp_vmem_limit(kv_fixed + tile_k * kv_row)),
    )(y_b, wk, wv, params["bk"], params["bv"])

    # ---------------- Main attention pallas_call ----------------
    attw_bytes = jnp.dtype(weights_dtype).itemsize if need_weights else 0
    main_fixed = (2 * 2 * D * D * 2                   # wq, wo bf16, double-buffered
                  + 2 * 2 * Lk * D * 2                # kh, vh bf16, double-buffered
                  + 2 * 6 * D * 4)                    # bias / LN vectors
    main_row = (2 * D * 4                             # x tile (dbl-buf)
                + 2 * D * 4                           # out tile (dbl-buf)
                + 2 * Lk * attw_bytes                 # attw tile (dbl-buf)
                + 3 * H * Lk * 4                      # scores / exp / p temporaries
                + 4 * D * 4)                          # q / ctx f32 temporaries
    tile_q = _pick_tile(Lq, main_row, main_fixed, 20 * 2**20)
    n_qt = Lq // tile_q

    kernel = functools.partial(_cross_attn_kernel, num_heads=H, head_dim=hd,
                               ln_eps=ln_eps, need_weights=need_weights)

    mat_spec = pl.BlockSpec((D, D), lambda b, qi: (0, 0))
    vec_spec = pl.BlockSpec((1, D), lambda b, qi: (0, 0))
    kv_spec = pl.BlockSpec((1, H, Lk, hd), lambda b, qi: (b, 0, 0, 0))

    out_shapes = [jax.ShapeDtypeStruct((B, Lq, D), jnp.float32)]
    out_specs = [pl.BlockSpec((1, tile_q, D), lambda b, qi: (b, qi, 0))]
    if need_weights:
        out_shapes.append(jax.ShapeDtypeStruct((B, Lq, Lk), weights_dtype))
        out_specs.append(pl.BlockSpec((1, tile_q, Lk), lambda b, qi: (b, qi, 0)))

    results = pl.pallas_call(
        kernel,
        out_shape=tuple(out_shapes),
        grid_spec=pltpu.PrefetchScalarGridSpec(
            num_scalar_prefetch=0,
            grid=(B, n_qt),
            in_specs=[
                pl.BlockSpec((1, tile_q, D), lambda b, qi: (b, qi, 0)),   # x tile (f32)
                kv_spec, kv_spec,                                          # kh, vh (bf16)
                mat_spec, mat_spec,                                        # wq, wo
                vec_spec, vec_spec,                                        # bq, bo
                vec_spec, vec_spec,                                        # ln gamma, beta
            ],
            out_specs=out_specs,
        ),
        compiler_params=pltpu.CompilerParams(
            dimension_semantics=("parallel", "parallel"),
            vmem_limit_bytes=_clamp_vmem_limit(main_fixed + tile_q * main_row)),
    )(x, kh, vh, wq, wo, bq, params["bo"], params["ln_g"], params["ln_b"])

    if need_weights:
        return results[0], results[1]
    return results[0]


def _reference(x, y, params, *, num_heads):
    # Pure-JAX f32 reference mirroring nn.MultiheadAttention(batch_first=True) + Pre-LN.
    D = x.shape[-1]
    hd = D // num_heads
    mean = jnp.mean(x, axis=-1, keepdims=True)
    var = jnp.mean((x - mean) ** 2, axis=-1, keepdims=True)
    xn = (x - mean) / jnp.sqrt(var + 1e-5) * params["ln_g"] + params["ln_b"]
    q = xn @ params["wq"] + params["bq"]
    k = y @ params["wk"] + params["bk"]
    v = y @ params["wv"] + params["bv"]
    B, Lq, _ = q.shape
    Lk = k.shape[1]
    qh = q.reshape(B, Lq, num_heads, hd).transpose(0, 2, 1, 3)
    kh = k.reshape(B, Lk, num_heads, hd).transpose(0, 2, 1, 3)
    vh = v.reshape(B, Lk, num_heads, hd).transpose(0, 2, 1, 3)
    scores = jnp.einsum("bhqd,bhkd->bhqk", qh, kh) / math.sqrt(hd)
    p = jax.nn.softmax(scores, axis=-1)
    ctx = jnp.einsum("bhqk,bhkd->bhqd", p, vh).transpose(0, 2, 1, 3).reshape(B, Lq, D)
    attn_out = ctx @ params["wo"] + params["bo"]
    return x + attn_out, p.mean(axis=1)


if __name__ == "__main__":
    B, Lq, Lk, D, H = 2, 8, 8, 32, 4

    key = jax.random.PRNGKey(0)
    ks = jax.random.split(key, 8)

    x = jax.random.normal(ks[0], (B, Lq, D), dtype=jnp.float32)
    y = jax.random.normal(ks[1], (B, Lk, D), dtype=jnp.float32)

    # Deterministic parameter init (shapes match nn.MultiheadAttention + nn.LayerNorm).
    params = {
        "wq": 0.05 * jax.random.normal(ks[2], (D, D), dtype=jnp.float32),
        "wk": 0.05 * jax.random.normal(ks[3], (D, D), dtype=jnp.float32),
        "wv": 0.05 * jax.random.normal(ks[4], (D, D), dtype=jnp.float32),
        "wo": 0.05 * jax.random.normal(ks[5], (D, D), dtype=jnp.float32),
        "bq": 0.01 * jax.random.normal(ks[6], (1, D), dtype=jnp.float32),
        "bk": jnp.zeros((1, D), dtype=jnp.float32),
        "bv": 0.01 * jax.random.normal(ks[7], (1, D), dtype=jnp.float32),
        "bo": jnp.zeros((1, D), dtype=jnp.float32),
        "ln_g": jnp.ones((1, D), dtype=jnp.float32),
        "ln_b": jnp.zeros((1, D), dtype=jnp.float32),
    }

    out, attw = cross_attention_layer(x, y, params, num_heads=H)
    out = jax.block_until_ready(out)
    attw = jax.block_until_ready(attw)

    ref_out, ref_attw = _reference(x, y, params, num_heads=H)
    # Tolerance accounts for bf16 MXU operands (f32 accumulation) and bf16 attw storage.
    np.testing.assert_allclose(np.asarray(out), np.asarray(ref_out), rtol=2e-2, atol=2e-2)
    np.testing.assert_allclose(np.asarray(attw).astype(np.float32),
                               np.asarray(ref_attw), rtol=2e-2, atol=2e-2)
    assert out.shape == (B, Lq, D) and attw.shape == (B, Lq, Lk)

    print("KERNEL_OK")
</pallas_src>

<mosaic_0001>
module attributes {stable_mosaic.version = 11 : i64} {
  func.func @_kv_proj_kernel(%arg0: i32, %arg1: i32, %arg2: memref<1x8x32xbf16, #tpu.memory_space<vmem>>, %arg3: memref<32x32xbf16, #tpu.memory_space<vmem>>, %arg4: memref<32x32xbf16, #tpu.memory_space<vmem>>, %arg5: memref<1x32xf32, #tpu.memory_space<vmem>>, %arg6: memref<1x32xf32, #tpu.memory_space<vmem>>, %arg7: memref<1x4x8x8xbf16, #tpu.memory_space<vmem>>, %arg8: memref<1x4x8x8xbf16, #tpu.memory_space<vmem>>) attributes {dimension_semantics = [#tpu.dimension_semantics<parallel>, #tpu.dimension_semantics<parallel>], iteration_bounds = array<i64: 2, 1>, scalar_prefetch = 0 : i64, scratch_operands = 0 : i64, tpu.core_type = #tpu.core_type<tc>, window_params = [{transform_indices = @transform_0, window_bounds = array<i64: 1, 8, 32>}, {pipeline_mode = #tpu.pipeline_mode<synchronous>, transform_indices = @transform_1, window_bounds = array<i64: 32, 32>}, {pipeline_mode = #tpu.pipeline_mode<synchronous>, transform_indices = @transform_2, window_bounds = array<i64: 32, 32>}, {pipeline_mode = #tpu.pipeline_mode<synchronous>, transform_indices = @transform_3, window_bounds = array<i64: 1, 32>}, {pipeline_mode = #tpu.pipeline_mode<synchronous>, transform_indices = @transform_4, window_bounds = array<i64: 1, 32>}, {transform_indices = @transform_5, window_bounds = array<i64: 1, 4, 8, 8>}, {transform_indices = @transform_6, window_bounds = array<i64: 1, 4, 8, 8>}]} {
    %c0 = arith.constant 0 : index
    %c0_0 = arith.constant 0 : index
    %c0_1 = arith.constant 0 : index
    %0 = vector.load %arg2[%c0, %c0_0, %c0_1] : memref<1x8x32xbf16, #tpu.memory_space<vmem>>, vector<1x8x32xbf16>
    %1 = vector.shape_cast %0 : vector<1x8x32xbf16> to vector<8x32xbf16>
    %c0_2 = arith.constant 0 : index
    %c0_3 = arith.constant 0 : index
    %2 = vector.load %arg3[%c0_2, %c0_3] : memref<32x32xbf16, #tpu.memory_space<vmem>>, vector<32x32xbf16>
    %cst = arith.constant dense<0.000000e+00> : vector<8x32xf32>
    %3 = tpu.matmul %1, %2, %cst {dimension_numbers = #tpu.dot_dimension_numbers<[1], [0], [0], [1], [0, 0, 1, 1], [], []>} : vector<8x32xbf16>, vector<32x32xbf16>, vector<8x32xf32> -> vector<8x32xf32>
    %c0_4 = arith.constant 0 : index
    %c0_5 = arith.constant 0 : index
    %4 = vector.load %arg5[%c0_4, %c0_5] : memref<1x32xf32, #tpu.memory_space<vmem>>, vector<1x32xf32>
    %5 = vector.broadcast %4 : vector<1x32xf32> to vector<8x32xf32>
    %6 = arith.addf %3, %5 : vector<8x32xf32>
    %c0_6 = arith.constant 0 : index
    %c0_7 = arith.constant 0 : index
    %7 = vector.load %arg4[%c0_6, %c0_7] : memref<32x32xbf16, #tpu.memory_space<vmem>>, vector<32x32xbf16>
    %cst_8 = arith.constant dense<0.000000e+00> : vector<8x32xf32>
    %8 = tpu.matmul %1, %7, %cst_8 {dimension_numbers = #tpu.dot_dimension_numbers<[1], [0], [0], [1], [0, 0, 1, 1], [], []>} : vector<8x32xbf16>, vector<32x32xbf16>, vector<8x32xf32> -> vector<8x32xf32>
    %c0_9 = arith.constant 0 : index
    %c0_10 = arith.constant 0 : index
    %9 = vector.load %arg6[%c0_9, %c0_10] : memref<1x32xf32, #tpu.memory_space<vmem>>, vector<1x32xf32>
    %10 = vector.broadcast %9 : vector<1x32xf32> to vector<8x32xf32>
    %11 = arith.addf %8, %10 : vector<8x32xf32>
    %12 = vector.shape_cast %6 : vector<8x32xf32> to vector<8x4x8xf32>
    %13 = tpu.transpose %12, [1, 0, 2] : vector<8x4x8xf32> -> vector<4x8x8xf32>
    %14 = arith.truncf %13 : vector<4x8x8xf32> to vector<4x8x8xbf16>
    %c0_11 = arith.constant 0 : index
    %c0_12 = arith.constant 0 : index
    %c0_13 = arith.constant 0 : index
    %c0_14 = arith.constant 0 : index
    %15 = vector.load %arg7[%c0_11, %c0_12, %c0_13, %c0_14] : memref<1x4x8x8xbf16, #tpu.memory_space<vmem>>, vector<1x4x8x8xbf16>
    %16 = vector.shape_cast %15 : vector<1x4x8x8xbf16> to vector<4x8x8xbf16>
    %17 = vector.shape_cast %14 : vector<4x8x8xbf16> to vector<1x4x8x8xbf16>
    tpu.vector_store %arg7[%c0_11, %c0_12, %c0_13, %c0_14], %17 {strides = array<i32>} : memref<1x4x8x8xbf16, #tpu.memory_space<vmem>>, vector<1x4x8x8xbf16>,
    %18 = vector.shape_cast %11 : vector<8x32xf32> to vector<8x4x8xf32>
    %19 = tpu.transpose %18, [1, 0, 2] : vector<8x4x8xf32> -> vector<4x8x8xf32>
    %20 = arith.truncf %19 : vector<4x8x8xf32> to vector<4x8x8xbf16>
    %c0_15 = arith.constant 0 : index
    %c0_16 = arith.constant 0 : index
    %c0_17 = arith.constant 0 : index
    %c0_18 = arith.constant 0 : index
    %21 = vector.load %arg8[%c0_15, %c0_16, %c0_17, %c0_18] : memref<1x4x8x8xbf16, #tpu.memory_space<vmem>>, vector<1x4x8x8xbf16>
    %22 = vector.shape_cast %21 : vector<1x4x8x8xbf16> to vector<4x8x8xbf16>
    %23 = vector.shape_cast %20 : vector<4x8x8xbf16> to vector<1x4x8x8xbf16>
    tpu.vector_store %arg8[%c0_15, %c0_16, %c0_17, %c0_18], %23 {strides = array<i32>} : memref<1x4x8x8xbf16, #tpu.memory_space<vmem>>, vector<1x4x8x8xbf16>,
    return
  }
  func.func @transform_0(%arg0: i32, %arg1: i32) -> (i32, i32, i32) {
    %c0_i32 = arith.constant 0 : i32
    %c0_i32_0 = arith.constant 0 : i32
    return %arg0, %arg1, %c0_i32 : i32, i32, i32
  }
  func.func @transform_1(%arg0: i32, %arg1: i32) -> (i32, i32) {
    %c0_i32 = arith.constant 0 : i32
    %c0_i32_0 = arith.constant 0 : i32
    %c0_i32_1 = arith.constant 0 : i32
    return %c0_i32, %c0_i32_0 : i32, i32
  }
  func.func @transform_2(%arg0: i32, %arg1: i32) -> (i32, i32) {
    %c0_i32 = arith.constant 0 : i32
    %c0_i32_0 = arith.constant 0 : i32
    %c0_i32_1 = arith.constant 0 : i32
    return %c0_i32, %c0_i32_0 : i32, i32
  }
  func.func @transform_3(%arg0: i32, %arg1: i32) -> (i32, i32) {
    %c0_i32 = arith.constant 0 : i32
    %c0_i32_0 = arith.constant 0 : i32
    %c0_i32_1 = arith.constant 0 : i32
    return %c0_i32, %c0_i32_0 : i32, i32
  }
  func.func @transform_4(%arg0: i32, %arg1: i32) -> (i32, i32) {
    %c0_i32 = arith.constant 0 : i32
    %c0_i32_0 = arith.constant 0 : i32
    %c0_i32_1 = arith.constant 0 : i32
    return %c0_i32, %c0_i32_0 : i32, i32
  }
  func.func @transform_5(%arg0: i32, %arg1: i32) -> (i32, i32, i32, i32) {
    %c0_i32 = arith.constant 0 : i32
    %c0_i32_0 = arith.constant 0 : i32
    %c0_i32_1 = arith.constant 0 : i32
    return %arg0, %c0_i32, %arg1, %c0_i32_0 : i32, i32, i32, i32
  }
  func.func @transform_6(%arg0: i32, %arg1: i32) -> (i32, i32, i32, i32) {
    %c0_i32 = arith.constant 0 : i32
    %c0_i32_0 = arith.constant 0 : i32
    %c0_i32_1 = arith.constant 0 : i32
    return %arg0, %c0_i32, %arg1, %c0_i32_0 : i32, i32, i32, i32
  }
}

</mosaic_0001>

<bundles_post_ra>
// kernel: tpu_custom_call.1
= control target key start
LH: loop header
LB: loop body
LE: loop exit
PB: predicated region body
PF: predicated region fallthrough
CT: control target
= control target key end

     0   :  { %12 = vsyncpa [#allocation3], 0  ;;  %s1716_s0 = inlined_call_operand.hbm [shape: bf16[2,8,32], index: 0, kind: input, shape index: {}]   ;;  %s1717_s1 = inlined_call_operand.hbm [shape: bf16[32,32], index: 1, kind: input, shape index: {}]   ;;  %s1718_s2 = inlined_call_operand.hbm [shape: bf16[32,32], index: 2, kind: input, shape index: {}]   ;;  %s1719_s3 = inlined_call_operand.vmem [shape: f32[1,32], index: 3, kind: input, shape index: {}]   ;;  %s1720_s4 = inlined_call_operand.vmem [shape: f32[1,32], index: 4, kind: input, shape index: {}]   ;;  %s1721_s5 = inlined_call_operand.hbm [shape: bf16[2,4,8,8], index: 5, kind: output, shape index: {0}]   ;;  %s1722_s6 = inlined_call_operand.hbm [shape: bf16[2,4,8,8], index: 6, kind: output, shape index: {1}]  }
   0x1   :  { %14 = vsyncpa [#allocation3 + $0x1], 0 }
   0x2   :  { %15 = vsyncpa [#allocation6], 0 }
   0x3   :  { %16 = vsyncpa [#allocation4], 0 }
   0x4   :  { %18 = vsyncpa [#allocation4 + $0x1], 0 }
   0x5   :  { %19 = vsyncpa [#allocation10], 0 }
   0x6   :  { %21 = vsyncpa [#allocation10 + $0x1], 0  ;;  %s1359_s21 = smov 0   ;;  %s1361_s22 = smov 0  }
   0x7   :  { %s1363_s23 = smov 0   ;;  %s1365_s24 = smov 0  }
   0x8   :  { %s1367_s25 = smov 0   ;;  %s1369_s26 = smov 0  }
   0x9 LB: > { %s941_s27 = sadd.s32 4294967295, %s1306_s26   ;;  %s942_s28 = sadd.s32 4294967294, %s1306_s26   ;;  %s1306_s26 = sphi %s1369_s26, %s27_s26   ;;  %s1302_s25 = sphi %s1367_s25, %s1747_s25   ;;  %s1298_s24 = sphi %s1365_s24, %s1746_s24   ;;  %s1294_s23 = sphi %s1363_s23, %s1745_s23   ;;  %s1290_s22 = sphi %s1361_s22, %s1744_s22   ;;  %s1286_s21 = sphi %s1359_s21, %s1743_s21  }
   0xa   : > { %p61_p0 = scmp.ne.s32.totalorder %s1290_s22, %s1286_s21  ;;  %p1393_p1 = scmp.eq.s32.totalorder %s941_s27, 0 }
   0xb   : > { %p1397_p2 = scmp.eq.s32.totalorder %s941_s27, 1  ;;  %p177_p3 = scmp.eq.s32.totalorder %s942_s28, 1 }
   0xc   : > { %s1728_s29 = scalar_select %p1393_p1, 1, 0 }
   0xd   : > { %p1403_p4 = por %p1393_p1, %p61_p0  ;;  %p943_p5 = scmp.ge.s32.totalorder %s1306_s26, 1 }
   0xe   : > { %p1408_p6 = por %p177_p3, %p61_p0  ;;  %p212_p7 = scmp.lt.s32.totalorder %s1306_s26, 3 }
   0xf   : > { %s1730_s7 = scalar_select %p1403_p4, 1, 0 }
  0x10   : > { %s1731_s8 = scalar_select %p1408_p6, 1, 0 }
  0x11   : > { %p1413_p8 = pnand %p943_p5, %p212_p7  ;;  %s1308_s10 = smov [#allocation5]  }
  0x12   : > { %1732 = sst [smem:[#allocation15_spill]] %s1731_s8  ;;  %s224_s11 = sshll.u32 %s1308_s10, 4  ;;  %s1417_s11 = int_to_ptr.vmem [resolvable:$true] %s224_s11 }
  0x13   : > { %p1013_p9 = pneg %p1413_p8  ;;  %s1309_s13 = smov [#allocation7]  }
  0x14   : > { %s237_s14 = sshll.u32 %s1309_s13, 4  ;;  %s1102_s17 = scalar_lea.hbm %s1717_s1, 256  ;;  %s1428_s14 = int_to_ptr.vmem [resolvable:$true] %s237_s14 }
  0x15   : > { %p1424_p11 = pnand %p1013_p9, %p1393_p1  ;;  %p1103_p12 = scmp.ne.s32.totalorder %s1717_s1, %s1102_s17 }
  0x16   : > { %p1109_p5 = scmp.lt.u32.totalorder %s1102_s17, %s1717_s1 }
  0x17   : > { %p1104_p13 = pneg %p1424_p11 }
  0x19   : > { %p1105_p0 = pnand %p1104_p13, %p1103_p12 }
  0x1b   : > { %p1106_p3 = pneg %p1105_p0 }
  0x1d   : > { %p1111_p7 = pnand %p1109_p5, %p1106_p3 }
  0x1f   : > { %1114 = shalt.err (!%p1111_p7)
}
  0x20   : > { %s1115_s28 = scalar_lea.vmem %s1417_s11, 256  ;;  %p1123_p1 = scmp.lt.s32.totalorder %s1417_s11, %s1417_s11 }
  0x21   : > { %p1116_p9 = scmp.ne.s32.totalorder %s1417_s11, %s1115_s28  ;;  %p1124_p12 = scmp.lt.s32.totalorder %s1115_s28, %s1115_s28 }
  0x23   : > { %p1118_p10 = pnand %p1116_p9, %p1104_p13  ;;  %p1125_p0 = por %p1124_p12, %p1123_p1 }
  0x25   : > { %p1119_p6 = pneg %p1118_p10 }
  0x27   : > { %p1126_p4 = pnand %p1125_p0, %p1119_p6 }
  0x29   : > { %1129 = shalt.err (!%p1126_p4)
}
  0x2a   : > { %s1310_s10 = smov 64   ;;  %s1311_s13 = smov 4  }
  0x2b   : > { %1016 = dma.hbm_to_vmem [thread:$0]  (!%p1424_p11), %s1717_s1, 256, %s1417_s11, [#allocation6], %s1310_s10, %s1310_s10, %s1311_s13  }
  0x2c   : > { %s1130_s19 = scalar_lea.hbm %s1718_s2, 256 }
  0x2d   : > { %p1131_p1 = scmp.ne.s32.totalorder %s1718_s2, %s1130_s19  ;;  %p1137_p10 = scmp.lt.u32.totalorder %s1130_s19, %s1718_s2 }
  0x2f   : > { %p1133_p4 = pnand %p1131_p1, %p1104_p13 }
  0x31   : > { %p1134_p6 = pneg %p1133_p4 }
  0x33   : > { %p1139_p3 = pnand %p1137_p10, %p1134_p6 }
  0x35   : > { %1142 = shalt.err (!%p1139_p3)
}
  0x36   : > { %s1143_s11 = scalar_lea.vmem %s1428_s14, 256  ;;  %p1151_p12 = scmp.lt.s32.totalorder %s1428_s14, %s1428_s14 }
  0x37   : > { %p1144_p5 = scmp.ne.s32.totalorder %s1428_s14, %s1143_s11  ;;  %p1152_p0 = scmp.lt.s32.totalorder %s1143_s11, %s1143_s11 }
  0x39   : > { %p1146_p7 = pnand %p1144_p5, %p1104_p13  ;;  %p1153_p1 = por %p1152_p0, %p1151_p12 }
  0x3b   : > { %p1147_p9 = pneg %p1146_p7 }
  0x3d   : > { %p1154_p4 = pnand %p1153_p1, %p1147_p9 }
  0x3f   : > { %1157 = shalt.err (!%p1154_p4)
}
  0x40   : > { %1019 = dma.hbm_to_vmem [thread:$0]  (!%p1424_p11), %s1718_s2, 256, %s1428_s14, [#allocation6], %s1310_s10, %s1310_s10, %s1311_s13  }
  0x41   : > { %s39_s16 = sadd.s32 1, %s1302_s25  ;;  %s48_s17 = sadd.s32 1, %s1294_s23 }
  0x42   : > { %p41_p13 = scmp.ge.s32.totalorder %s39_s16, 2  ;;  %p55_p6 = scmp.ne.s32.totalorder %s1294_s23, %s1290_s22 }
  0x43   : > { %p56_p10 = scmp.eq.s32.totalorder %s1306_s26, 0  ;;  %p1033_p3 = scmp.lt.s32.totalorder %s1306_s26, 2 }
  0x44   : > { %s1749_s16 = smov (%p41_p13, %s39_s16), 0  ;;  %p1492_p7 = por %p1397_p2, %p55_p6 }
  0x45   : > { %p57_p5 = por %p56_p10, %p55_p6  ;;  %s43_s18 = ssub.s32 %s1302_s25, %s1749_s16 }
  0x46   : > { %s1735_s12 = scalar_select %p1492_p7, 1, 0 }
  0x47   : > { %s257_s19 = sand.u32 1, %s1294_s23   ;;  %p46_p9 = scmp.eq.s32.totalorder %s43_s18, 0 }
  0x48   : > { %s947_s14 = sshll.u32 %s257_s19, 2  ;;  %s948_s10 = sshll.u32 %s1302_s25, 6 }
  0x49   : > { %s1501_s13 = scalar_select %p46_p9, %s1294_s23, %s48_s17  }
  0x4a   : > { %s1506_s28 = scalar_lea.hbm %s1716_s0, %s948_s10  ;;  %s261_s30 = scalar_lea.vmem [#allocation2], %s947_s14 }
  0x4b   : > { %s269_s11 = sshll.u32 %s261_s30, 4  ;;  %p1510_p2 = pnand %p1033_p3, %p57_p5  ;;  %s1514_s11 = int_to_ptr.vmem [resolvable:$true] %s269_s11 }
  0x4c   : > { %s258_s15 = scalar_lea.sflag [#allocation3], %s257_s19  ;;  %s1158_s17 = scalar_lea.hbm %s1506_s28, 64 }
  0x4d   : > { %p1159_p11 = scmp.ne.s32.totalorder %s1506_s28, %s1158_s17  ;;  %p1160_p12 = pneg %p1510_p2 }
  0x4e   : > { %s1163_s10 = scalar_lea.hbm %s1716_s0, 128  ;;  %p1164_p4 = scmp.lt.u32.totalorder %s1506_s28, %s1716_s0 }
  0x4f   : > { %p1161_p0 = pnand %p1160_p12, %p1159_p11  ;;  %p1165_p13 = scmp.lt.u32.totalorder %s1163_s10, %s1158_s17 }
  0x50   : > { %p1167_p10 = scmp.lt.u32.totalorder %s1158_s17, %s1506_s28 }
  0x51   : > { %p1162_p1 = pneg %p1161_p0  ;;  %p1166_p6 = por %p1165_p13, %p1164_p4 }
  0x53   : > { %p1168_p3 = por %p1167_p10, %p1166_p6 }
  0x55   : > { %p1169_p5 = pnand %p1168_p3, %p1162_p1 }
  0x57   : > { %1172 = shalt.err (!%p1169_p5)
}
  0x58   : > { %s1173_s19 = scalar_lea.vmem %s1514_s11, 64  ;;  %s1312_s30 = smov [#allocation2]  }
  0x59   : > { %p1174_p9 = scmp.ne.s32.totalorder %s1514_s11, %s1173_s19  ;;  %s1178_s18 = sshll.u32 %s1312_s30, 4  ;;  %s1179_s18 = int_to_ptr.vmem [resolvable:$false] %s1178_s18 }
  0x5a   : > { %s1180_s14 = scalar_lea.vmem %s1179_s18, 128  ;;  %p1181_p7 = scmp.lt.s32.totalorder %s1514_s11, %s1179_s18 }
  0x5b   : > { %p1176_p11 = pnand %p1174_p9, %p1160_p12  ;;  %p1182_p4 = scmp.lt.s32.totalorder %s1180_s14, %s1173_s19 }
  0x5d   : > { %p1177_p0 = pneg %p1176_p11  ;;  %p1183_p13 = por %p1182_p4, %p1181_p7 }
  0x5f   : > { %p1184_p6 = pnand %p1183_p13, %p1177_p0 }
  0x61   : > { %1187 = shalt.err (!%p1184_p6)
}
  0x62   : > { %1023 = dma.hbm_to_vmem [thread:$0]  (!%p1510_p2), %s1506_s28, 64, %s1514_s11, %s258_s15  }
  0x63   : > { %278 = sbr.rel (%p1413_p8) target bundleno = 513 (0x201), region = 40  ;;  %s1544_s17 = sand.u32 (!%p1413_p8), 1, %s1290_s22  }
  0x64   : > { %s950_s10 = sshll.u32 (!%p1413_p8), %s1544_s17, 2  ;;  %s281_s20 = scalar_lea.sflag (!%p1413_p8), [#allocation3], %s1544_s17 }
  0x65   : > { %s284_s27 = scalar_lea.vmem (!%p1413_p8), [#allocation2], %s950_s10  ;;  %p1737_p7 = scmp.ne.s32.totalorder (!%p1413_p8), %s1730_s7, 0 }
  0x6a   : > { %1269 = dma.done.wait (%p1737_p7), %s281_s20, 64  }
  0x6b   : > { %1271 = vsyncadd (%p1737_p7), %s281_s20, 4294967232  ;;  %p1738_p12 = scmp.ne.s32.totalorder %s1728_s29, 0 }
  0x6d   : > { %1273 = dma.done.wait (%p1738_p12), [#allocation6], 512  }
  0x6e   : > { %1275 = vsyncadd (%p1738_p12), [#allocation6], 4294966784  ;;  %v1313_v0 = vmov 0.0   ;;  %vm1314_vm0 = vmmov 0   ;;  %v1098_v1 = vld [vmem:[#allocation5] sm:$0xff]   ;;  %v1099_v2 = vld [vmem:[#allocation7] sm:$0xff]   ;;  %v473_v20 = vlaneseq }
  0x6f   : > { %983 = vmatprep.subr.bf16.mxu0 %v1313_v0  ;;  %991 = vmatprep.subr.bf16.mxu1 %v1313_v0  ;;  %v1100_v3 = vld [vmem:[#allocation5 + $0x8] sm:$0xff]   ;;  %v1101_v4 = vld [vmem:[#allocation7 + $0x8] sm:$0xff]   ;;  %vm351_vm1 = vcmask 261120   ;;  %s1315_s11 = smov 104   ;;  %s1316_s8 = smov 120   ;;  %vm608_vm2 = vcmask 60416  }
  0x70   : > { %987 = vmatprep.mubr.msk.bf16.mxu0 %vm1314_vm0, %v1313_v0  ;;  %995 = vmatprep.mubr.msk.bf16.mxu1 %vm1314_vm0, %v1313_v0  ;;  %v327_v5 = vld [vmem:[%s284_s27] sm:$0xf]  ;;  %s1317_s15 = smov 112   ;;  %v1318_v18 = vmov 1983009808   ;;  %v474_v24 = vshrl.u32 %v473_v20, 7 }
  0x71   : > { %984 = vmatpush3.bf16.msra.mxu0 %v1098_v1  ;;  %992 = vmatpush3.bf16.msra.mxu1 %v1099_v2  ;;  %v955_v6 = vld [vmem:[%s1719_s3] ss:$0 sm:$0xff]  ;;  %v471_v19 = vunpack.c.l.s4 %v1318_v18  ;;  %v1319_v21 = vmov 1934713408   ;;  %s953_s19 = sshll.u32 %s1544_s17, 4  ;;  %s975_s30 = sshll.u32 %s1298_s24, 8 }
  0x72   : > { %985 = vmatprep.subr.bf16.mxu0 %v1313_v0  ;;  %993 = vmatprep.subr.bf16.mxu1 %v1313_v0  ;;  %v959_v8 = vld [vmem:[%s1720_s4] ss:$0 sm:$0xff]  ;;  %v503_v22 = vunpack.c.l.s4 %v1319_v21  ;;  %s318_s18 = scalar_lea.vmem [#allocation8], %s953_s19  ;;  %s1603_s27 = scalar_lea.hbm %s1721_s5, %s975_s30 }
  0x73   : > { %v472_v23 = vunpack.c.0.s8 %v471_v19  ;;  %s787_s14 = sshll.u32 %s318_s18, 4  ;;  %s1617_s29 = scalar_lea.vmem [#allocation9], %s953_s19  ;;  %s1605_s14 = int_to_ptr.vmem [resolvable:$true] %s787_s14 }
  0x74   : > { %v504_v27 = vunpack.c.0.s8 %v503_v22  ;;  %s804_s7 = sshll.u32 %s1617_s29, 4  ;;  %s768_s9 = scalar_lea.sflag [#allocation4], %s1544_s17  ;;  %s1656_s7 = int_to_ptr.vmem [resolvable:$true] %s804_s7 }
  0x75   : > { %986 = vmatpush3.bf16.msra.mxu0 %v1100_v3  ;;  %994 = vmatpush3.bf16.msra.mxu1 %v1101_v4  ;;  %v1562_v28 = vsub.s32 %v472_v23, %v474_v24  ;;  %s1188_s28 = scalar_lea.vmem %s1605_s14, 256  ;;  %p1739_p2 = scmp.ne.s32.totalorder %s1735_s12, 0 }
  0x76   : > { %v1564_v35 = vsub.s32 %v504_v27, %v474_v24  ;;  %p1189_p8 = scmp.ne.s32.totalorder %s1605_s14, %s1188_s28 }
  0x78   : > { %988 = vmatmul.mubr.msk.bf16.vlgmr.msra.gmra.mrb[0].mxu0 %vm351_vm1, %v327_v5  ;;  %996 = vmatmul.mubr.msk.bf16.vlgmr.msra.gmra.mrb[0].mxu1 %vm351_vm1, %v327_v5  ;;  %p1190_p1 = pnand %p1189_p8, %p1739_p2 }
  0x7a   : > { %p1191_p10 = pneg %p1190_p1 }
 0x14b   : > { %v389_v7 = vpop.f32.mrb[0].mxu0  ;;  %v452_v11 = vpop.f32.mrb[0].mxu1 }
 0x14c   : > { %v390_v9 = vadd.f32 %v955_v6, %v389_v7  ;;  %v989_v10 = vpop.f32.mrb[1].mxu0  ;;  %v997_v13 = vpop.f32.mrb[1].mxu1  ;;  %v453_v14 = vadd.f32 %v959_v8, %v452_v11 }
 0x14d   : > { %v392_v12 = vpop.f32.mrb[2].mxu0  ;;  %v455_v15 = vpop.f32.mrb[2].mxu1 }
 0x14e   : > { %465 = vrot.lane.b32.xlu1 %v390_v9, %s1315_s11  ;;  %459 = vrot.lane.b32.xlu0 %v390_v9, %s1316_s8  ;;  %v990_v16 = vpop.f32.mrb[3].mxu0  ;;  %v998_v17 = vpop.f32.mrb[3].mxu1 }
 0x152   : > { %614 = vrot.lane.b32.xlu1 %v453_v14, %s1316_s8  ;;  %462 = vrot.lane.b32.xlu0 %v390_v9, %s1317_s15 }
 0x156   : > { %620 = vrot.lane.b32.xlu1 %v453_v14, %s1315_s11  ;;  %617 = vrot.lane.b32.xlu0 %v453_v14, %s1317_s15  ;;  %s1320_s11 = smov [#allocation8]  }
 0x157   : > { %s1192_s8 = sshll.u32 %s1320_s11, 4  ;;  %s1193_s8 = int_to_ptr.vmem [resolvable:$false] %s1192_s8 }
 0x158   : > { %s1194_s15 = scalar_lea.vmem %s1193_s8, 512  ;;  %p1195_p3 = scmp.lt.s32.totalorder %s1605_s14, %s1193_s8 }
 0x159   : > { %p1196_p5 = scmp.lt.s32.totalorder %s1194_s15, %s1188_s28 }
 0x15b   : > { %p1197_p9 = por %p1196_p5, %p1195_p3 }
 0x15d   : > { %p1198_p11 = pnand %p1197_p9, %p1191_p10 }
 0x1c0   : > { %v466_v25 = vpop.permute.xlu1 %465  ;;  %v460_v26 = vpop.permute.xlu0 %459 }
 0x1c1   : > { %v484_v29 = vcombine.low %v460_v26, %v466_v25  ;;  %v485_v30 = vcombine.high %v460_v26, %v466_v25 }
 0x1c3   : > { %v492_v36 = vrot.slane %v484_v29, %v1562_v28  ;;  %v499_v37 = vrot.slane %v485_v30, %v1562_v28 }
 0x1c4   : > { %v615_v31 = vpop.permute.xlu1 %614  ;;  %v463_v32 = vpop.permute.xlu0 %462 }
 0x1c5   : > { %v468_v33 = vcombine.low %v390_v9, %v463_v32  ;;  %v469_v34 = vcombine.high %v390_v9, %v463_v32 }
 0x1c7   : > { %v476_v38 = vrot.slane %v468_v33, %v1562_v28  ;;  %v483_v39 = vrot.slane %v469_v34, %v1562_v28 }
 0x1c8   : > { %v621_v40 = vpop.permute.xlu1 %620  ;;  %v618_v41 = vpop.permute.xlu0 %617 }
 0x1c9   : > { %v500_v42 = vcombine.low %v476_v38, %v492_v36  ;;  %v501_v43 = vcombine.high %v476_v38, %v492_v36  ;;  %v516_v44 = vcombine.low %v483_v39, %v499_v37  ;;  %v517_v45 = vcombine.high %v483_v39, %v499_v37 }
 0x1ca   : > { %v639_v46 = vcombine.low %v615_v31, %v621_v40  ;;  %v640_v47 = vcombine.high %v615_v31, %v621_v40  ;;  %v623_v48 = vcombine.low %v453_v14, %v618_v41  ;;  %v624_v49 = vcombine.high %v453_v14, %v618_v41 }
 0x1cb   : > { %v508_v50 = vrot.slane %v500_v42, %v1564_v35  ;;  %v515_v51 = vrot.slane %v501_v43, %v1564_v35  ;;  %v524_v52 = vrot.slane %v516_v44, %v1564_v35  ;;  %v531_v53 = vrot.slane %v517_v45, %v1564_v35 }
 0x1cc   : > { %v647_v54 = vrot.slane %v639_v46, %v1562_v28  ;;  %v654_v55 = vrot.slane %v640_v47, %v1562_v28  ;;  %v631_v56 = vrot.slane %v623_v48, %v1562_v28  ;;  %v638_v57 = vrot.slane %v624_v49, %v1562_v28 }
 0x1cd   : > { %v536_v58 = vcombine.low %v508_v50, %v515_v51  ;;  %v963_v59 = vcombine.high %v508_v50, %v515_v51  ;;  %v552_v60 = vcombine.low %v524_v52, %v531_v53  ;;  %v964_v61 = vcombine.high %v524_v52, %v531_v53 }
 0x1ce   : > { %v655_v62 = vcombine.low %v631_v56, %v647_v54  ;;  %v656_v63 = vcombine.high %v631_v56, %v647_v54  ;;  %v671_v0 = vcombine.low %v638_v57, %v654_v55  ;;  %v672_v1 = vcombine.high %v638_v57, %v654_v55 }
 0x1cf   : > { %v543_v2 = vrot.slane %v536_v58, %v1562_v28  ;;  %v551_v3 = vrot.slane %v963_v59, %v1562_v28  ;;  %v559_v4 = vrot.slane %v552_v60, %v1562_v28  ;;  %v567_v5 = vrot.slane %v964_v61, %v1562_v28 }
 0x1d0   : > { %v663_v6 = vrot.slane %v655_v62, %v1564_v35  ;;  %v670_v7 = vrot.slane %v656_v63, %v1564_v35  ;;  %v679_v8 = vrot.slane %v671_v0, %v1564_v35  ;;  %v686_v9 = vrot.slane %v672_v1, %v1564_v35 }
 0x1d1   : > { %v568_v10 = vcombine.low %v543_v2, %v551_v3  ;;  %v569_v11 = vcombine.high %v543_v2, %v551_v3  ;;  %v584_v12 = vcombine.low %v559_v4, %v567_v5  ;;  %v585_v13 = vcombine.high %v559_v4, %v567_v5 }
 0x1d2   : > { %v691_v14 = vcombine.low %v663_v6, %v670_v7  ;;  %v965_v15 = vcombine.high %v663_v6, %v670_v7  ;;  %v707_v16 = vcombine.low %v679_v8, %v686_v9  ;;  %v966_v17 = vcombine.high %v679_v8, %v686_v9 }
 0x1d3   : > { %v576_v18 = vrot.slane %v568_v10, %v1564_v35  ;;  %v583_v19 = vrot.slane %v569_v11, %v1564_v35  ;;  %v592_v20 = vrot.slane %v584_v12, %v1564_v35  ;;  %v599_v21 = vrot.slane %v585_v13, %v1564_v35 }
 0x1d4   : > { %v698_v22 = vrot.slane %v691_v14, %v1562_v28  ;;  %v706_v23 = vrot.slane %v965_v15, %v1562_v28  ;;  %v714_v24 = vrot.slane %v707_v16, %v1562_v28  ;;  %v722_v25 = vrot.slane %v966_v17, %v1562_v28 }
 0x1d5   : > { %v600_v26 = vcombine.low %v576_v18, %v592_v20  ;;  %v601_v27 = vcombine.high %v576_v18, %v592_v20  ;;  %v602_v29 = vcombine.low %v583_v19, %v599_v21  ;;  %v603_v30 = vcombine.high %v583_v19, %v599_v21 }
 0x1d6   : > { %v723_v31 = vcombine.low %v698_v22, %v706_v23  ;;  %v724_v32 = vcombine.high %v698_v22, %v706_v23  ;;  %v739_v33 = vcombine.low %v714_v24, %v722_v25  ;;  %v740_v34 = vcombine.high %v714_v24, %v722_v25 }
 0x1d7   : > { %v604_v36 = vpack.c.bf16 %v600_v26, %v600_v26  ;;  %v605_v37 = vpack.c.bf16 %v601_v27, %v601_v27  ;;  %v606_v28 = vpack.c.bf16 %v602_v29, %v602_v29  ;;  %v607_v38 = vpack.c.bf16 %v603_v30, %v603_v30 }
 0x1d8   : > { %v731_v39 = vrot.slane %v723_v31, %v1564_v35  ;;  %v738_v40 = vrot.slane %v724_v32, %v1564_v35  ;;  %v747_v41 = vrot.slane %v739_v33, %v1564_v35  ;;  %v754_v42 = vrot.slane %v740_v34, %v1564_v35 }
 0x1d9   : > { %609 = vst.msk [vmem:[%s318_s18] sm:$0xf] %vm608_vm2, %v604_v36  ;;  %610 = vst.msk [vmem:[%s318_s18 + $0x4] sm:$0xf] %vm608_vm2, %v605_v37 }
 0x1da   : > { %611 = vst.msk [vmem:[%s318_s18 + $0x8] sm:$0xf] %vm608_vm2, %v606_v28  ;;  %612 = vst.msk [vmem:[%s318_s18 + $0xc] sm:$0xf] %vm608_vm2, %v607_v38  ;;  %v755_v43 = vcombine.low %v731_v39, %v747_v41  ;;  %v756_v44 = vcombine.high %v731_v39, %v747_v41  ;;  %v757_v45 = vcombine.low %v738_v40, %v754_v42 }
 0x1db   : > { %v758_v46 = vcombine.high %v738_v40, %v754_v42 }
 0x1dc   : > { %1201 = shalt.err (!%p1198_p11)
}
 0x1dd   : > { %s1202_s19 = scalar_lea.hbm %s1603_s27, 256  ;;  %s1206_s20 = scalar_lea.hbm %s1721_s5, 512 }
 0x1de   : > { %p1203_p0 = scmp.ne.s32.totalorder %s1603_s27, %s1202_s19  ;;  %p1207_p6 = scmp.lt.u32.totalorder %s1603_s27, %s1721_s5 }
 0x1df   : > { %p1208_p7 = scmp.lt.u32.totalorder %s1206_s20, %s1202_s19  ;;  %p1210_p8 = scmp.lt.u32.totalorder %s1202_s19, %s1603_s27 }
 0x1e0   : > { %p1204_p4 = pnand %p1203_p0, %p1739_p2 }
 0x1e1   : > { %p1209_p12 = por %p1208_p7, %p1207_p6 }
 0x1e2   : > { %p1205_p13 = pneg %p1204_p4 }
 0x1e3   : > { %p1211_p1 = por %p1210_p8, %p1209_p12 }
 0x1e5   : > { %p1212_p10 = pnand %p1211_p1, %p1205_p13 }
 0x1e7   : > { %1215 = shalt.err (!%p1212_p10)
}
 0x1e8   : > { %s1321_s28 = smov 64   ;;  %s1322_s15 = smov 4   ;;  %v759_v35 = vpack.c.bf16 %v755_v43, %v755_v43  ;;  %v760_v47 = vpack.c.bf16 %v756_v44, %v756_v44  ;;  %v761_v48 = vpack.c.bf16 %v757_v45, %v757_v45  ;;  %v762_v49 = vpack.c.bf16 %v758_v46, %v758_v46 }
 0x1e9   : > { %1009 = dma.vmem_to_hbm [thread:$0]  (%p1739_p2), %s1605_s14, 256, %s1603_s27, %s768_s9, %s1321_s28, %s1321_s28, %s1322_s15  }
 0x1ea   : > { %s1652_s10 = scalar_lea.hbm %s1722_s6, %s975_s30  ;;  %763 = vst.msk [vmem:[%s1617_s29] sm:$0xf] %vm608_vm2, %v759_v35  ;;  %764 = vst.msk [vmem:[%s1617_s29 + $0x4] sm:$0xf] %vm608_vm2, %v760_v47  ;;  %s773_s24 = scalar_lea.sflag [#allocation10], %s1544_s17 }
 0x1eb   : > { %765 = vst.msk [vmem:[%s1617_s29 + $0x8] sm:$0xf] %vm608_vm2, %v761_v48  ;;  %766 = vst.msk [vmem:[%s1617_s29 + $0xc] sm:$0xf] %vm608_vm2, %v762_v49  ;;  %s1216_s14 = scalar_lea.vmem %s1656_s7, 256  ;;  %s1323_s30 = smov [#allocation9]  }
 0x1ec   : > { %p1217_p3 = scmp.ne.s32.totalorder %s1656_s7, %s1216_s14  ;;  %s1220_s27 = sshll.u32 %s1323_s30, 4  ;;  %s1221_s27 = int_to_ptr.vmem [resolvable:$false] %s1220_s27 }
 0x1ed   : > { %s1222_s9 = scalar_lea.vmem %s1221_s27, 512  ;;  %p1223_p11 = scmp.lt.s32.totalorder %s1656_s7, %s1221_s27 }
 0x1ee   : > { %p1218_p5 = pnand %p1217_p3, %p1739_p2  ;;  %p1224_p0 = scmp.lt.s32.totalorder %s1222_s9, %s1216_s14 }
 0x1f0   : > { %p1219_p9 = pneg %p1218_p5  ;;  %p1225_p4 = por %p1224_p0, %p1223_p11 }
 0x1f2   : > { %p1226_p13 = pnand %p1225_p4, %p1219_p9 }
 0x1f4   : > { %1229 = shalt.err (!%p1226_p13)
}
 0x1f5   : > { %s1230_s29 = scalar_lea.hbm %s1652_s10, 256  ;;  %s1234_s8 = scalar_lea.hbm %s1722_s6, 512 }
 0x1f6   : > { %p1231_p6 = scmp.ne.s32.totalorder %s1652_s10, %s1230_s29  ;;  %p1235_p8 = scmp.lt.u32.totalorder %s1652_s10, %s1722_s6 }
 0x1f7   : > { %p1236_p1 = scmp.lt.u32.totalorder %s1234_s8, %s1230_s29  ;;  %p1238_p3 = scmp.lt.u32.totalorder %s1230_s29, %s1652_s10 }
 0x1f8   : > { %p1232_p7 = pnand %p1231_p6, %p1739_p2 }
 0x1f9   : > { %p1237_p10 = por %p1236_p1, %p1235_p8 }
 0x1fa   : > { %p1233_p12 = pneg %p1232_p7 }
 0x1fb   : > { %p1239_p5 = por %p1238_p3, %p1237_p10 }
 0x1fd   : > { %p1240_p9 = pnand %p1239_p5, %p1233_p12 }
 0x1ff   : > { %1243 = shalt.err (!%p1240_p9)
}
 0x200   : > { %1010 = dma.vmem_to_hbm [thread:$0]  (%p1739_p2), %s1656_s7, 256, %s1652_s10, %s773_s24, %s1321_s28, %s1321_s28, %s1322_s15  }
 0x201 PF: > { %s1740_s14 = sld [smem:[#allocation15_spill]]  ;;  %s819_s30 = sand.u32 1, %s1286_s21  }
 0x202   : > { %p1742_p0 = scmp.ge.s32.totalorder %s1306_s26, 2  ;;  %s820_s27 = scalar_lea.sflag [#allocation4], %s819_s30 }
 0x207   : > { %p1741_p11 = scmp.ne.s32.totalorder %s1740_s14, 0 }
 0x209   : > { %p1025_p4 = pnand %p1742_p0, %p1741_p11 }
 0x20b   : > { %1277 = dma.done.wait (!%p1025_p4), %s820_s27, 256  }
 0x20c   : > { %1279 = vsyncadd (!%p1025_p4), %s820_s27, 4294967040  ;;  %s829_s12 = scalar_lea.sflag [#allocation10], %s819_s30 }
 0x20d   : > { %1281 = dma.done.wait (!%p1025_p4), %s829_s12, 256  }
 0x20e   : > { %1283 = vsyncadd (!%p1025_p4), %s829_s12, 4294967040  ;;  %s27_s26 = sadd.s32 1, %s1306_s26   ;;  %s1743_s21 = smov %s1290_s22 }
 0x20f   : > { %p24_p13 = scmp.ge.s32.totalorder %s27_s26, 4   ;;  %s1744_s22 = smov %s1294_s23 }
 0x210   : > { %s1745_s23 = smov %s1501_s13  ;;  %s1746_s24 = smov %s1302_s25 }
 0x211   : > { %s1747_s25 = smov %s1749_s16  ;;  %26 = sbr.rel (!%p24_p13) target bundleno = 9 (0x9), region = 110 }
 0x218   :  { %834 = vsyncpa [#allocation3], 1 }
 0x219   :  { %836 = vsyncpa [#allocation3 + $0x1], 1 }
 0x21a   :  { %837 = vsyncpa [#allocation6], 1 }
 0x21b   :  { %838 = vsyncpa [#allocation4], 1 }
 0x21c   :  { %840 = vsyncpa [#allocation4 + $0x1], 1 }
 0x21d   :  { %841 = vsyncpa [#allocation10], 1 }
 0x21e   :  { %843 = vsyncpa [#allocation10 + $0x1], 1 }

</bundles_post_ra>
